<compile_context>
chip_gen: v7x
topology: tpu7x:2x2x1
jax: 0.10.0
libtpu: 0.0.40
codegen_flags: <defaults>
</compile_context>

<pallas_src>
import functools

import jax
import jax.numpy as jnp
from jax.experimental import pallas as pl
from jax.experimental.pallas import tpu as pltpu


# --------------------------------------------------------------------------
# Fused kernel: 3 x (Linear + folded BN [+ ReLU])  +  k x (gumbel_softmax ->
# running max).  Everything stays resident in VMEM; no HBM round trips.
# --------------------------------------------------------------------------
def _masker_kernel(f_ref, w1_ref, w2_ref, w3_ref, bias_ref, g_ref, z_ref, *,
                   k, tau, middle, num_classes):
    # Packed biases: static slices of a VMEM ref are free.
    b1 = bias_ref[:, 0:middle]
    b2 = bias_ref[:, middle:2 * middle]
    b3 = bias_ref[:, 2 * middle:2 * middle + num_classes]

    # ---- MLP (Dropout = identity in eval; BN folded into W'/b' on host) ----
    # bf16 matmul operands (MXU-native), f32 accumulation + f32 epilogue.
    h = jnp.dot(f_ref[...].astype(jnp.bfloat16), w1_ref[...],
                preferred_element_type=jnp.float32)
    h = jnp.maximum(h + b1, 0.0)                                # ReLU
    h = jnp.dot(h.astype(jnp.bfloat16), w2_ref[...],
                preferred_element_type=jnp.float32)
    h = jnp.maximum(h + b2, 0.0)                                # ReLU
    mask = jnp.dot(h.astype(jnp.bfloat16), w3_ref[...],
                   preferred_element_type=jnp.float32)
    mask = mask + b3

    # ---- k x gumbel_softmax(dim=1, tau, hard=False) + running max ----------
    # The soft sample becomes the next iteration's logits (matches PyTorch);
    # elementwise path stays f32 (no bf16 VPU/EUP on v5e; feedback precision).
    inv_tau = jnp.float32(1.0 / tau)
    z = jnp.zeros_like(mask)
    for i in range(k):                    # static trip count -> fully unrolled
        logits = (mask + g_ref[i]) * inv_tau
        m = jnp.max(logits, axis=-1, keepdims=True)
        e = jnp.exp(logits - m)
        s = jnp.sum(e, axis=-1, keepdims=True)
        r = pl.reciprocal(s, approx=True)       # EUP slot, off VPU crit path
        r = r * (2.0 - s * r)                   # one Newton step -> ~exact
        y = e * r                               # softmax over classes (dim=1)
        z = jnp.maximum(y, z)
        mask = y
    z_ref[...] = z


def masker_pallas(f, w1, w2, w3, bias_packed, gumbel, *, k, tau,
                  middle, num_classes):
    B = f.shape[0]
    kern = functools.partial(_masker_kernel, k=k, tau=tau,
                             middle=middle, num_classes=num_classes)
    vmem = pl.BlockSpec(memory_space=pltpu.MemorySpace.VMEM)
    # Single program, whole arrays resident in VMEM (~0.3 MiB at these shapes
    # with bf16 weights -> fits every generation's scoped-VMEM default,
    # including v7x's 64 MiB physical / 32 MiB scoped budget).
    # TODO(synk): if B grows to hundreds+ of rows, add a batch grid with
    # dimension_semantics=("parallel",) (tiling f / gumbel / z in multiples of
    # 8, keeping C as the lane-dense last output dim) so v7x's 2 TensorCores
    # both get work, and keep the bf16 weights as un-gridded VMEM inputs.
    return pl.pallas_call(
        kern,
        out_shape=jax.ShapeDtypeStruct((B, num_classes), jnp.float32),
        in_specs=[vmem] * 6,
        out_specs=vmem,
    )(f, w1, w2, w3, bias_packed, gumbel)


# --------------------------------------------------------------------------
# Host-side one-time parameter prep (NOT on the per-call path).
# --------------------------------------------------------------------------
def fold_bn_into_linear(w, b, gamma, beta, rmean, rvar, eps=1e-5):
    """Linear -> BN (running stats):  W' = W * s (column scale), b' = b*s + t,
    with s = gamma/sqrt(var+eps), t = beta - mean*s."""
    s = gamma / jnp.sqrt(rvar + eps)
    t = beta - rmean * s
    return w * s[None, :], b * s + t


def prepare_params(params):
    """Fold BN, cast weights to bf16, pack biases. Call ONCE and cache the
    result; the forward pass then only dispatches the fused pallas_call."""
    w1, b1 = fold_bn_into_linear(params["w1"], params["b1"],
                                 params["bn1_gamma"], params["bn1_beta"],
                                 params["bn1_mean"], params["bn1_var"])
    w2, b2 = fold_bn_into_linear(params["w2"], params["b2"],
                                 params["bn2_gamma"], params["bn2_beta"],
                                 params["bn2_mean"], params["bn2_var"])
    C = params["w3"].shape[1]
    w3, b3 = fold_bn_into_linear(params["w3"], params["b3"],
                                 jnp.ones((C,), jnp.float32),   # affine=False
                                 jnp.zeros((C,), jnp.float32),
                                 params["bn3_mean"], params["bn3_var"])
    bias_packed = jnp.concatenate([b1, b2, b3]).reshape(1, -1).astype(jnp.float32)
    return {
        "w1": w1.astype(jnp.bfloat16),
        "w2": w2.astype(jnp.bfloat16),
        "w3": w3.astype(jnp.bfloat16),
        "bias": bias_packed,
        "middle": int(params["w1"].shape[1]),
        "num_classes": int(C),
    }


def masker_forward(f, prepared, gumbel, *, k, tau=0.5):
    # nn.Dropout(0.5) -> identity (inference); BN already folded in `prepared`.
    return masker_pallas(f, prepared["w1"], prepared["w2"], prepared["w3"],
                         prepared["bias"], gumbel, k=k, tau=tau,
                         middle=prepared["middle"],
                         num_classes=prepared["num_classes"])


def init_params(key, in_dim, middle, num_classes):
    ks = jax.random.split(key, 16)
    p = {}
    # Linear 1: in_dim -> middle, BatchNorm1d(middle, affine=True)
    p["w1"] = jax.random.normal(ks[0], (in_dim, middle), jnp.float32) * (in_dim ** -0.5)
    p["b1"] = jax.random.normal(ks[1], (middle,), jnp.float32) * 0.01
    p["bn1_gamma"] = 1.0 + 0.1 * jax.random.normal(ks[2], (middle,), jnp.float32)
    p["bn1_beta"] = 0.1 * jax.random.normal(ks[3], (middle,), jnp.float32)
    p["bn1_mean"] = 0.1 * jax.random.normal(ks[4], (middle,), jnp.float32)
    p["bn1_var"] = 1.0 + 0.1 * jax.random.uniform(ks[5], (middle,), jnp.float32)
    # Linear 2: middle -> middle, BatchNorm1d(middle, affine=True)
    p["w2"] = jax.random.normal(ks[6], (middle, middle), jnp.float32) * (middle ** -0.5)
    p["b2"] = jax.random.normal(ks[7], (middle,), jnp.float32) * 0.01
    p["bn2_gamma"] = 1.0 + 0.1 * jax.random.normal(ks[8], (middle,), jnp.float32)
    p["bn2_beta"] = 0.1 * jax.random.normal(ks[9], (middle,), jnp.float32)
    p["bn2_mean"] = 0.1 * jax.random.normal(ks[10], (middle,), jnp.float32)
    p["bn2_var"] = 1.0 + 0.1 * jax.random.uniform(ks[11], (middle,), jnp.float32)
    # Linear 3: middle -> num_classes, then BatchNorm1d(num_classes, affine=False)
    p["w3"] = jax.random.normal(ks[12], (middle, num_classes), jnp.float32) * (middle ** -0.5)
    p["b3"] = jax.random.normal(ks[13], (num_classes,), jnp.float32) * 0.01
    p["bn3_mean"] = 0.1 * jax.random.normal(ks[14], (num_classes,), jnp.float32)
    p["bn3_var"] = 1.0 + 0.1 * jax.random.uniform(ks[15], (num_classes,), jnp.float32)
    return p


if __name__ == "__main__":
    # Small shapes consistent with Masker(in_dim, num_classes, middle, k)
    B, IN_DIM, MIDDLE, NUM_CLASSES, K, TAU = 8, 128, 256, 128, 8, 0.5

    key = jax.random.PRNGKey(0)
    kf, kp, kg = jax.random.split(key, 3)
    f = jax.random.normal(kf, (B, IN_DIM), jnp.float32)
    params = init_params(kp, IN_DIM, MIDDLE, NUM_CLASSES)
    # Standard Gumbel(0,1) noise for the k gumbel_softmax draws (host-side PRNG;
    # the in-kernel PRNG has no interpret lowering).
    gumbel = jax.random.gumbel(kg, (K, B, NUM_CLASSES), jnp.float32)

    # One-time prep (BN fold + bf16 cast + bias packing) -- off the call path.
    prepared = jax.tree_util.tree_map(
        lambda x: jax.block_until_ready(x) if isinstance(x, jax.Array) else x,
        prepare_params(params))

    z = masker_forward(f, prepared, gumbel, k=K, tau=TAU)
    z = jax.block_until_ready(z)

    assert z.shape == (B, NUM_CLASSES)
    assert bool(jnp.all(jnp.isfinite(z)))
    # soft gumbel-softmax outputs lie in (0, 1]; running max preserves that
    # (tiny tolerance for the Newton-refined approximate reciprocal)
    assert bool(jnp.all(z >= 0.0)) and bool(jnp.all(z <= 1.0 + 1e-5))
    print("KERNEL_OK")
</pallas_src>

<mosaic_0001>
module attributes {stable_mosaic.version = 11 : i64} {
  func.func @_masker_kernel(%arg0: memref<8x128xf32, #tpu.memory_space<vmem>>, %arg1: memref<128x256xbf16, #tpu.memory_space<vmem>>, %arg2: memref<256x256xbf16, #tpu.memory_space<vmem>>, %arg3: memref<256x128xbf16, #tpu.memory_space<vmem>>, %arg4: memref<1x640xf32, #tpu.memory_space<vmem>>, %arg5: memref<8x8x128xf32, #tpu.memory_space<vmem>>, %arg6: memref<8x128xf32, #tpu.memory_space<vmem>>) attributes {dimension_semantics = [], scalar_prefetch = 0 : i64, scratch_operands = 0 : i64, tpu.core_type = #tpu.core_type<tc>} {
    %c0 = arith.constant 0 : index
    %c0_0 = arith.constant 0 : index
    %0 = vector.load %arg4[%c0, %c0_0] : memref<1x640xf32, #tpu.memory_space<vmem>>, vector<1x256xf32>
    %c0_1 = arith.constant 0 : index
    %c256 = arith.constant 256 : index
    %1 = vector.load %arg4[%c0_1, %c256] : memref<1x640xf32, #tpu.memory_space<vmem>>, vector<1x256xf32>
    %c0_2 = arith.constant 0 : index
    %c512 = arith.constant 512 : index
    %2 = vector.load %arg4[%c0_2, %c512] : memref<1x640xf32, #tpu.memory_space<vmem>>, vector<1x128xf32>
    %c0_3 = arith.constant 0 : index
    %c0_4 = arith.constant 0 : index
    %3 = vector.load %arg0[%c0_3, %c0_4] : memref<8x128xf32, #tpu.memory_space<vmem>>, vector<8x128xf32>
    %4 = arith.truncf %3 : vector<8x128xf32> to vector<8x128xbf16>
    %c0_5 = arith.constant 0 : index
    %c0_6 = arith.constant 0 : index
    %5 = vector.load %arg1[%c0_5, %c0_6] : memref<128x256xbf16, #tpu.memory_space<vmem>>, vector<128x256xbf16>
    %cst = arith.constant dense<0.000000e+00> : vector<8x256xf32>
    %6 = tpu.matmul %4, %5, %cst {dimension_numbers = #tpu.dot_dimension_numbers<[1], [0], [0], [1], [0, 0, 1, 1], [], []>} : vector<8x128xbf16>, vector<128x256xbf16>, vector<8x256xf32> -> vector<8x256xf32>
    %7 = vector.broadcast %0 : vector<1x256xf32> to vector<8x256xf32>
    %8 = arith.addf %6, %7 : vector<8x256xf32>
    %cst_7 = arith.constant 0.000000e+00 : f32
    %9 = vector.broadcast %cst_7 : f32 to vector<8x256xf32>
    %10 = arith.maximumf %8, %9 : vector<8x256xf32>
    %11 = arith.truncf %10 : vector<8x256xf32> to vector<8x256xbf16>
    %c0_8 = arith.constant 0 : index
    %c0_9 = arith.constant 0 : index
    %12 = vector.load %arg2[%c0_8, %c0_9] : memref<256x256xbf16, #tpu.memory_space<vmem>>, vector<256x256xbf16>
    %cst_10 = arith.constant dense<0.000000e+00> : vector<8x256xf32>
    %13 = tpu.matmul %11, %12, %cst_10 {dimension_numbers = #tpu.dot_dimension_numbers<[1], [0], [0], [1], [0, 0, 1, 1], [], []>} : vector<8x256xbf16>, vector<256x256xbf16>, vector<8x256xf32> -> vector<8x256xf32>
    %14 = vector.broadcast %1 : vector<1x256xf32> to vector<8x256xf32>
    %15 = arith.addf %13, %14 : vector<8x256xf32>
    %cst_11 = arith.constant 0.000000e+00 : f32
    %16 = vector.broadcast %cst_11 : f32 to vector<8x256xf32>
    %17 = arith.maximumf %15, %16 : vector<8x256xf32>
    %18 = arith.truncf %17 : vector<8x256xf32> to vector<8x256xbf16>
    %c0_12 = arith.constant 0 : index
    %c0_13 = arith.constant 0 : index
    %19 = vector.load %arg3[%c0_12, %c0_13] : memref<256x128xbf16, #tpu.memory_space<vmem>>, vector<256x128xbf16>
    %cst_14 = arith.constant dense<0.000000e+00> : vector<8x128xf32>
    %20 = tpu.matmul %18, %19, %cst_14 {dimension_numbers = #tpu.dot_dimension_numbers<[1], [0], [0], [1], [0, 0, 1, 1], [], []>} : vector<8x256xbf16>, vector<256x128xbf16>, vector<8x128xf32> -> vector<8x128xf32>
    %21 = vector.broadcast %2 : vector<1x128xf32> to vector<8x128xf32>
    %22 = arith.addf %20, %21 : vector<8x128xf32>
    %cst_15 = arith.constant 0.000000e+00 : f32
    %23 = vector.broadcast %cst_15 : f32 to vector<8x128xf32>
    %c0_16 = arith.constant 0 : index
    %c0_17 = arith.constant 0 : index
    %c0_18 = arith.constant 0 : index
    %24 = vector.load %arg5[%c0_16, %c0_17, %c0_18] : memref<8x8x128xf32, #tpu.memory_space<vmem>>, vector<1x8x128xf32>
    %25 = vector.shape_cast %24 : vector<1x8x128xf32> to vector<8x128xf32>
    %26 = arith.addf %22, %25 : vector<8x128xf32>
    %cst_19 = arith.constant 2.000000e+00 : f32
    %27 = vector.broadcast %cst_19 : f32 to vector<8x128xf32>
    %28 = arith.mulf %26, %27 : vector<8x128xf32>
    %cst_20 = arith.constant dense<0xFF800000> : vector<8xf32>
    %29 = vector.multi_reduction <maximumf>, %28, %cst_20 [1] : vector<8x128xf32> to vector<8xf32>
    %30 = vector.shape_cast %29 : vector<8xf32> to vector<8x1xf32>
    %31 = vector.broadcast %30 : vector<8x1xf32> to vector<8x128xf32>
    %32 = arith.subf %28, %31 : vector<8x128xf32>
    %33 = math.exp %32 : vector<8x128xf32>
    %cst_21 = arith.constant dense<0.000000e+00> : vector<8xf32>
    %34 = vector.multi_reduction <add>, %33, %cst_21 [1] : vector<8x128xf32> to vector<8xf32>
    %35 = vector.shape_cast %34 : vector<8xf32> to vector<8x1xf32>
    %36 = tpu.reciprocal %35 {approx = true} : vector<8x1xf32> -> vector<8x1xf32>
    %37 = arith.mulf %35, %36 : vector<8x1xf32>
    %cst_22 = arith.constant 2.000000e+00 : f32
    %38 = vector.broadcast %cst_22 : f32 to vector<8x1xf32>
    %39 = arith.subf %38, %37 : vector<8x1xf32>
    %40 = arith.mulf %36, %39 : vector<8x1xf32>
    %41 = vector.broadcast %40 : vector<8x1xf32> to vector<8x128xf32>
    %42 = arith.mulf %33, %41 : vector<8x128xf32>
    %43 = arith.maximumf %42, %23 : vector<8x128xf32>
    %c1 = arith.constant 1 : index
    %c0_23 = arith.constant 0 : index
    %c0_24 = arith.constant 0 : index
    %44 = vector.load %arg5[%c1, %c0_23, %c0_24] : memref<8x8x128xf32, #tpu.memory_space<vmem>>, vector<1x8x128xf32>
    %45 = vector.shape_cast %44 : vector<1x8x128xf32> to vector<8x128xf32>
    %46 = arith.addf %42, %45 : vector<8x128xf32>
    %cst_25 = arith.constant 2.000000e+00 : f32
    %47 = vector.broadcast %cst_25 : f32 to vector<8x128xf32>
    %48 = arith.mulf %46, %47 : vector<8x128xf32>
    %cst_26 = arith.constant dense<0xFF800000> : vector<8xf32>
    %49 = vector.multi_reduction <maximumf>, %48, %cst_26 [1] : vector<8x128xf32> to vector<8xf32>
    %50 = vector.shape_cast %49 : vector<8xf32> to vector<8x1xf32>
    %51 = vector.broadcast %50 : vector<8x1xf32> to vector<8x128xf32>
    %52 = arith.subf %48, %51 : vector<8x128xf32>
    %53 = math.exp %52 : vector<8x128xf32>
    %cst_27 = arith.constant dense<0.000000e+00> : vector<8xf32>
    %54 = vector.multi_reduction <add>, %53, %cst_27 [1] : vector<8x128xf32> to vector<8xf32>
    %55 = vector.shape_cast %54 : vector<8xf32> to vector<8x1xf32>
    %56 = tpu.reciprocal %55 {approx = true} : vector<8x1xf32> -> vector<8x1xf32>
    %57 = arith.mulf %55, %56 : vector<8x1xf32>
    %cst_28 = arith.constant 2.000000e+00 : f32
    %58 = vector.broadcast %cst_28 : f32 to vector<8x1xf32>
    %59 = arith.subf %58, %57 : vector<8x1xf32>
    %60 = arith.mulf %56, %59 : vector<8x1xf32>
    %61 = vector.broadcast %60 : vector<8x1xf32> to vector<8x128xf32>
    %62 = arith.mulf %53, %61 : vector<8x128xf32>
    %63 = arith.maximumf %62, %43 : vector<8x128xf32>
    %c2 = arith.constant 2 : index
    %c0_29 = arith.constant 0 : index
    %c0_30 = arith.constant 0 : index
    %64 = vector.load %arg5[%c2, %c0_29, %c0_30] : memref<8x8x128xf32, #tpu.memory_space<vmem>>, vector<1x8x128xf32>
    %65 = vector.shape_cast %64 : vector<1x8x128xf32> to vector<8x128xf32>
    %66 = arith.addf %62, %65 : vector<8x128xf32>
    %cst_31 = arith.constant 2.000000e+00 : f32
    %67 = vector.broadcast %cst_31 : f32 to vector<8x128xf32>
    %68 = arith.mulf %66, %67 : vector<8x128xf32>
    %cst_32 = arith.constant dense<0xFF800000> : vector<8xf32>
    %69 = vector.multi_reduction <maximumf>, %68, %cst_32 [1] : vector<8x128xf32> to vector<8xf32>
    %70 = vector.shape_cast %69 : vector<8xf32> to vector<8x1xf32>
    %71 = vector.broadcast %70 : vector<8x1xf32> to vector<8x128xf32>
    %72 = arith.subf %68, %71 : vector<8x128xf32>
    %73 = math.exp %72 : vector<8x128xf32>
    %cst_33 = arith.constant dense<0.000000e+00> : vector<8xf32>
    %74 = vector.multi_reduction <add>, %73, %cst_33 [1] : vector<8x128xf32> to vector<8xf32>
    %75 = vector.shape_cast %74 : vector<8xf32> to vector<8x1xf32>
    %76 = tpu.reciprocal %75 {approx = true} : vector<8x1xf32> -> vector<8x1xf32>
    %77 = arith.mulf %75, %76 : vector<8x1xf32>
    %cst_34 = arith.constant 2.000000e+00 : f32
    %78 = vector.broadcast %cst_34 : f32 to vector<8x1xf32>
    %79 = arith.subf %78, %77 : vector<8x1xf32>
    %80 = arith.mulf %76, %79 : vector<8x1xf32>
    %81 = vector.broadcast %80 : vector<8x1xf32> to vector<8x128xf32>
    %82 = arith.mulf %73, %81 : vector<8x128xf32>
    %83 = arith.maximumf %82, %63 : vector<8x128xf32>
    %c3 = arith.constant 3 : index
    %c0_35 = arith.constant 0 : index
    %c0_36 = arith.constant 0 : index
    %84 = vector.load %arg5[%c3, %c0_35, %c0_36] : memref<8x8x128xf32, #tpu.memory_space<vmem>>, vector<1x8x128xf32>
    %85 = vector.shape_cast %84 : vector<1x8x128xf32> to vector<8x128xf32>
    %86 = arith.addf %82, %85 : vector<8x128xf32>
    %cst_37 = arith.constant 2.000000e+00 : f32
    %87 = vector.broadcast %cst_37 : f32 to vector<8x128xf32>
    %88 = arith.mulf %86, %87 : vector<8x128xf32>
    %cst_38 = arith.constant dense<0xFF800000> : vector<8xf32>
    %89 = vector.multi_reduction <maximumf>, %88, %cst_38 [1] : vector<8x128xf32> to vector<8xf32>
    %90 = vector.shape_cast %89 : vector<8xf32> to vector<8x1xf32>
    %91 = vector.broadcast %90 : vector<8x1xf32> to vector<8x128xf32>
    %92 = arith.subf %88, %91 : vector<8x128xf32>
    %93 = math.exp %92 : vector<8x128xf32>
    %cst_39 = arith.constant dense<0.000000e+00> : vector<8xf32>
    %94 = vector.multi_reduction <add>, %93, %cst_39 [1] : vector<8x128xf32> to vector<8xf32>
    %95 = vector.shape_cast %94 : vector<8xf32> to vector<8x1xf32>
    %96 = tpu.reciprocal %95 {approx = true} : vector<8x1xf32> -> vector<8x1xf32>
    %97 = arith.mulf %95, %96 : vector<8x1xf32>
    %cst_40 = arith.constant 2.000000e+00 : f32
    %98 = vector.broadcast %cst_40 : f32 to vector<8x1xf32>
    %99 = arith.subf %98, %97 : vector<8x1xf32>
    %100 = arith.mulf %96, %99 : vector<8x1xf32>
    %101 = vector.broadcast %100 : vector<8x1xf32> to vector<8x128xf32>
    %102 = arith.mulf %93, %101 : vector<8x128xf32>
    %103 = arith.maximumf %102, %83 : vector<8x128xf32>
    %c4 = arith.constant 4 : index
    %c0_41 = arith.constant 0 : index
    %c0_42 = arith.constant 0 : index
    %104 = vector.load %arg5[%c4, %c0_41, %c0_42] : memref<8x8x128xf32, #tpu.memory_space<vmem>>, vector<1x8x128xf32>
    %105 = vector.shape_cast %104 : vector<1x8x128xf32> to vector<8x128xf32>
    %106 = arith.addf %102, %105 : vector<8x128xf32>
    %cst_43 = arith.constant 2.000000e+00 : f32
    %107 = vector.broadcast %cst_43 : f32 to vector<8x128xf32>
    %108 = arith.mulf %106, %107 : vector<8x128xf32>
    %cst_44 = arith.constant dense<0xFF800000> : vector<8xf32>
    %109 = vector.multi_reduction <maximumf>, %108, %cst_44 [1] : vector<8x128xf32> to vector<8xf32>
    %110 = vector.shape_cast %109 : vector<8xf32> to vector<8x1xf32>
    %111 = vector.broadcast %110 : vector<8x1xf32> to vector<8x128xf32>
    %112 = arith.subf %108, %111 : vector<8x128xf32>
    %113 = math.exp %112 : vector<8x128xf32>
    %cst_45 = arith.constant dense<0.000000e+00> : vector<8xf32>
    %114 = vector.multi_reduction <add>, %113, %cst_45 [1] : vector<8x128xf32> to vector<8xf32>
    %115 = vector.shape_cast %114 : vector<8xf32> to vector<8x1xf32>
    %116 = tpu.reciprocal %115 {approx = true} : vector<8x1xf32> -> vector<8x1xf32>
    %117 = arith.mulf %115, %116 : vector<8x1xf32>
    %cst_46 = arith.constant 2.000000e+00 : f32
    %118 = vector.broadcast %cst_46 : f32 to vector<8x1xf32>
    %119 = arith.subf %118, %117 : vector<8x1xf32>
    %120 = arith.mulf %116, %119 : vector<8x1xf32>
    %121 = vector.broadcast %120 : vector<8x1xf32> to vector<8x128xf32>
    %122 = arith.mulf %113, %121 : vector<8x128xf32>
    %123 = arith.maximumf %122, %103 : vector<8x128xf32>
    %c5 = arith.constant 5 : index
    %c0_47 = arith.constant 0 : index
    %c0_48 = arith.constant 0 : index
    %124 = vector.load %arg5[%c5, %c0_47, %c0_48] : memref<8x8x128xf32, #tpu.memory_space<vmem>>, vector<1x8x128xf32>
    %125 = vector.shape_cast %124 : vector<1x8x128xf32> to vector<8x128xf32>
    %126 = arith.addf %122, %125 : vector<8x128xf32>
    %cst_49 = arith.constant 2.000000e+00 : f32
    %127 = vector.broadcast %cst_49 : f32 to vector<8x128xf32>
    %128 = arith.mulf %126, %127 : vector<8x128xf32>
    %cst_50 = arith.constant dense<0xFF800000> : vector<8xf32>
    %129 = vector.multi_reduction <maximumf>, %128, %cst_50 [1] : vector<8x128xf32> to vector<8xf32>
    %130 = vector.shape_cast %129 : vector<8xf32> to vector<8x1xf32>
    %131 = vector.broadcast %130 : vector<8x1xf32> to vector<8x128xf32>
    %132 = arith.subf %128, %131 : vector<8x128xf32>
    %133 = math.exp %132 : vector<8x128xf32>
    %cst_51 = arith.constant dense<0.000000e+00> : vector<8xf32>
    %134 = vector.multi_reduction <add>, %133, %cst_51 [1] : vector<8x128xf32> to vector<8xf32>
    %135 = vector.shape_cast %134 : vector<8xf32> to vector<8x1xf32>
    %136 = tpu.reciprocal %135 {approx = true} : vector<8x1xf32> -> vector<8x1xf32>
    %137 = arith.mulf %135, %136 : vector<8x1xf32>
    %cst_52 = arith.constant 2.000000e+00 : f32
    %138 = vector.broadcast %cst_52 : f32 to vector<8x1xf32>
    %139 = arith.subf %138, %137 : vector<8x1xf32>
    %140 = arith.mulf %136, %139 : vector<8x1xf32>
    %141 = vector.broadcast %140 : vector<8x1xf32> to vector<8x128xf32>
    %142 = arith.mulf %133, %141 : vector<8x128xf32>
    %143 = arith.maximumf %142, %123 : vector<8x128xf32>
    %c6 = arith.constant 6 : index
    %c0_53 = arith.constant 0 : index
    %c0_54 = arith.constant 0 : index
    %144 = vector.load %arg5[%c6, %c0_53, %c0_54] : memref<8x8x128xf32, #tpu.memory_space<vmem>>, vector<1x8x128xf32>
    %145 = vector.shape_cast %144 : vector<1x8x128xf32> to vector<8x128xf32>
    %146 = arith.addf %142, %145 : vector<8x128xf32>
    %cst_55 = arith.constant 2.000000e+00 : f32
    %147 = vector.broadcast %cst_55 : f32 to vector<8x128xf32>
    %148 = arith.mulf %146, %147 : vector<8x128xf32>
    %cst_56 = arith.constant dense<0xFF800000> : vector<8xf32>
    %149 = vector.multi_reduction <maximumf>, %148, %cst_56 [1] : vector<8x128xf32> to vector<8xf32>
    %150 = vector.shape_cast %149 : vector<8xf32> to vector<8x1xf32>
    %151 = vector.broadcast %150 : vector<8x1xf32> to vector<8x128xf32>
    %152 = arith.subf %148, %151 : vector<8x128xf32>
    %153 = math.exp %152 : vector<8x128xf32>
    %cst_57 = arith.constant dense<0.000000e+00> : vector<8xf32>
    %154 = vector.multi_reduction <add>, %153, %cst_57 [1] : vector<8x128xf32> to vector<8xf32>
    %155 = vector.shape_cast %154 : vector<8xf32> to vector<8x1xf32>
    %156 = tpu.reciprocal %155 {approx = true} : vector<8x1xf32> -> vector<8x1xf32>
    %157 = arith.mulf %155, %156 : vector<8x1xf32>
    %cst_58 = arith.constant 2.000000e+00 : f32
    %158 = vector.broadcast %cst_58 : f32 to vector<8x1xf32>
    %159 = arith.subf %158, %157 : vector<8x1xf32>
    %160 = arith.mulf %156, %159 : vector<8x1xf32>
    %161 = vector.broadcast %160 : vector<8x1xf32> to vector<8x128xf32>
    %162 = arith.mulf %153, %161 : vector<8x128xf32>
    %163 = arith.maximumf %162, %143 : vector<8x128xf32>
    %c7 = arith.constant 7 : index
    %c0_59 = arith.constant 0 : index
    %c0_60 = arith.constant 0 : index
    %164 = vector.load %arg5[%c7, %c0_59, %c0_60] : memref<8x8x128xf32, #tpu.memory_space<vmem>>, vector<1x8x128xf32>
    %165 = vector.shape_cast %164 : vector<1x8x128xf32> to vector<8x128xf32>
    %166 = arith.addf %162, %165 : vector<8x128xf32>
    %cst_61 = arith.constant 2.000000e+00 : f32
    %167 = vector.broadcast %cst_61 : f32 to vector<8x128xf32>
    %168 = arith.mulf %166, %167 : vector<8x128xf32>
    %cst_62 = arith.constant dense<0xFF800000> : vector<8xf32>
    %169 = vector.multi_reduction <maximumf>, %168, %cst_62 [1] : vector<8x128xf32> to vector<8xf32>
    %170 = vector.shape_cast %169 : vector<8xf32> to vector<8x1xf32>
    %171 = vector.broadcast %170 : vector<8x1xf32> to vector<8x128xf32>
    %172 = arith.subf %168, %171 : vector<8x128xf32>
    %173 = math.exp %172 : vector<8x128xf32>
    %cst_63 = arith.constant dense<0.000000e+00> : vector<8xf32>
    %174 = vector.multi_reduction <add>, %173, %cst_63 [1] : vector<8x128xf32> to vector<8xf32>
    %175 = vector.shape_cast %174 : vector<8xf32> to vector<8x1xf32>
    %176 = tpu.reciprocal %175 {approx = true} : vector<8x1xf32> -> vector<8x1xf32>
    %177 = arith.mulf %175, %176 : vector<8x1xf32>
    %cst_64 = arith.constant 2.000000e+00 : f32
    %178 = vector.broadcast %cst_64 : f32 to vector<8x1xf32>
    %179 = arith.subf %178, %177 : vector<8x1xf32>
    %180 = arith.mulf %176, %179 : vector<8x1xf32>
    %181 = vector.broadcast %180 : vector<8x1xf32> to vector<8x128xf32>
    %182 = arith.mulf %173, %181 : vector<8x128xf32>
    %183 = arith.maximumf %182, %163 : vector<8x128xf32>
    %c0_65 = arith.constant 0 : index
    %c0_66 = arith.constant 0 : index
    %184 = vector.load %arg6[%c0_65, %c0_66] : memref<8x128xf32, #tpu.memory_space<vmem>>, vector<8x128xf32>
    tpu.vector_store %arg6[%c0_65, %c0_66], %183 {strides = array<i32>} : memref<8x128xf32, #tpu.memory_space<vmem>>, vector<8x128xf32>,
    return
  }
}

</mosaic_0001>

<bundles_post_ra>
// kernel: tpu_custom_call.1
= control target key start
LH: loop header
LB: loop body
LE: loop exit
PB: predicated region body
PF: predicated region fallthrough
CT: control target
= control target key end

     0   :  { %11 = vsyncpa [#allocation3], 0  ;;  %s1324_s0 = inlined_call_operand.hbm [shape: f32[8,128], index: 0, kind: input, shape index: {}]   ;;  %s1325_s1 = inlined_call_operand.hbm [shape: bf16[128,256], index: 1, kind: input, shape index: {}]   ;;  %s1326_s2 = inlined_call_operand.hbm [shape: bf16[256,256], index: 2, kind: input, shape index: {}]   ;;  %s1327_s3 = inlined_call_operand.hbm [shape: bf16[256,128], index: 3, kind: input, shape index: {}]   ;;  %s1328_s4 = inlined_call_operand.vmem [shape: f32[1,640], index: 4, kind: input, shape index: {}]   ;;  %s1329_s5 = inlined_call_operand.hbm [shape: f32[8,8,128], index: 5, kind: input, shape index: {}]   ;;  %s1330_s6 = inlined_call_operand.hbm [shape: f32[8,128], index: 6, kind: output, shape index: {}]  }
   0x1   :  { %12 = vsyncpa [#allocation6], 0 }
   0x2   :  { %13 = vsyncpa [#allocation9], 0 }
   0x3   :  { %14 = vsyncpa [#allocation4], 0  ;;  %s1181_s21 = smov [#allocation5]   ;;  %s1041_s25 = scalar_lea.hbm %s1325_s1, 2048 }
   0x4   :  { %s30_s22 = sshll.u32 %s1181_s21, 4  ;;  %p1042_p0 = scmp.ne.s32.totalorder %s1325_s1, %s1041_s25  ;;  %s31_s22 = int_to_ptr.vmem [resolvable:$true] %s30_s22 }
   0x5   :  { %p1045_p1 = scmp.lt.u32.totalorder %s1041_s25, %s1325_s1 }
   0x7   :  { %p1047_p2 = pnand %p1045_p1, %p1042_p0 }
   0x9   :  { %1050 = shalt.err (!%p1047_p2)
}
   0xa   :  { %s1051_s30 = scalar_lea.vmem %s31_s22, 2048  ;;  %p1056_p4 = scmp.lt.s32.totalorder %s31_s22, %s31_s22 }
   0xb   :  { %p1052_p3 = scmp.ne.s32.totalorder %s31_s22, %s1051_s30  ;;  %p1057_p5 = scmp.lt.s32.totalorder %s1051_s30, %s1051_s30 }
   0xd   :  { %p1058_p6 = por %p1057_p5, %p1056_p4 }
   0xf   :  { %p1059_p7 = pnand %p1058_p6, %p1052_p3 }
  0x11   :  { %1062 = shalt.err (!%p1059_p7)
}
  0x12   :  { %s1182_s7 = smov 128   ;;  %s1183_s8 = smov 8  }
  0x13   :  { %36 = dma.hbm_to_vmem [thread:$0]  %s1325_s1, 2048, %s31_s22, [#allocation6], %s1182_s7, %s1182_s7, %s1183_s8  }
  0x14   :  { %s1184_s11 = smov [#allocation8]   ;;  %s1063_s15 = scalar_lea.hbm %s1327_s3, 2048 }
  0x15   :  { %s54_s12 = sshll.u32 %s1184_s11, 4  ;;  %p1064_p8 = scmp.ne.s32.totalorder %s1327_s3, %s1063_s15  ;;  %s55_s12 = int_to_ptr.vmem [resolvable:$true] %s54_s12 }
  0x16   :  { %p1067_p9 = scmp.lt.u32.totalorder %s1063_s15, %s1327_s3 }
  0x18   :  { %p1069_p10 = pnand %p1067_p9, %p1064_p8 }
  0x1a   :  { %1072 = shalt.err (!%p1069_p10)
}
  0x1b   :  { %s1073_s20 = scalar_lea.vmem %s55_s12, 2048  ;;  %p1078_p12 = scmp.lt.s32.totalorder %s55_s12, %s55_s12 }
  0x1c   :  { %p1074_p11 = scmp.ne.s32.totalorder %s55_s12, %s1073_s20  ;;  %p1079_p13 = scmp.lt.s32.totalorder %s1073_s20, %s1073_s20 }
  0x1e   :  { %p1080_p0 = por %p1079_p13, %p1078_p12 }
  0x20   :  { %p1081_p1 = pnand %p1080_p0, %p1074_p11 }
  0x22   :  { %1084 = shalt.err (!%p1081_p1)
}
  0x23   :  { %s1185_s1 = smov 64   ;;  %s1186_s21 = smov 4  }
  0x24   :  { %60 = dma.hbm_to_vmem [thread:$0]  %s1327_s3, 2048, %s55_s12, [#allocation9], %s1185_s1, %s1185_s1, %s1186_s21  }
  0x25   :  { %s1187_s24 = smov [#allocation2]   ;;  %s1188_s26 = smov [#allocation7]  }
  0x26   :  { %s21_s25 = sshll.u32 %s1187_s24, 4  ;;  %s42_s27 = sshll.u32 %s1188_s26, 4  ;;  %s22_s25 = int_to_ptr.vmem [resolvable:$true] %s21_s25  ;;  %s1254_s27 = int_to_ptr.vmem [resolvable:$true] %s42_s27 }
  0x27   :  { %s1085_s30 = scalar_lea.hbm %s1324_s0, 128 }
  0x28   :  { %p1086_p2 = scmp.ne.s32.totalorder %s1324_s0, %s1085_s30  ;;  %p1089_p3 = scmp.lt.u32.totalorder %s1085_s30, %s1324_s0 }
  0x2a   :  { %p1091_p4 = pnand %p1089_p3, %p1086_p2 }
  0x2c   :  { %1094 = shalt.err (!%p1091_p4)
}
  0x2d   :  { %s1095_s3 = scalar_lea.vmem %s22_s25, 128  ;;  %p1100_p6 = scmp.lt.s32.totalorder %s22_s25, %s22_s25 }
  0x2e   :  { %p1096_p5 = scmp.ne.s32.totalorder %s22_s25, %s1095_s3  ;;  %p1101_p7 = scmp.lt.s32.totalorder %s1095_s3, %s1095_s3 }
  0x30   :  { %p1102_p8 = por %p1101_p7, %p1100_p6 }
  0x32   :  { %p1103_p9 = pnand %p1102_p8, %p1096_p5 }
  0x34   :  { %1106 = shalt.err (!%p1103_p9)
}
  0x35   :  { %24 = dma.hbm_to_vmem [thread:$0]  %s1324_s0, 128, %s22_s25, [#allocation3]  }
  0x36   :  { %s1107_s17 = scalar_lea.hbm %s1326_s2, 4096 }
  0x37   :  { %p1108_p10 = scmp.ne.s32.totalorder %s1326_s2, %s1107_s17  ;;  %p1111_p11 = scmp.lt.u32.totalorder %s1107_s17, %s1326_s2 }
  0x39   :  { %p1113_p12 = pnand %p1111_p11, %p1108_p10 }
  0x3b   :  { %1116 = shalt.err (!%p1113_p12)
}
  0x3c   :  { %s1117_s21 = scalar_lea.vmem %s1254_s27, 4096  ;;  %p1122_p0 = scmp.lt.s32.totalorder %s1254_s27, %s1254_s27 }
  0x3d   :  { %p1118_p13 = scmp.ne.s32.totalorder %s1254_s27, %s1117_s21  ;;  %p1123_p1 = scmp.lt.s32.totalorder %s1117_s21, %s1117_s21 }
  0x3f   :  { %p1124_p2 = por %p1123_p1, %p1122_p0 }
  0x41   :  { %p1125_p3 = pnand %p1124_p2, %p1118_p13 }
  0x43   :  { %1128 = shalt.err (!%p1125_p3)
}
  0x44   :  { %48 = dma.hbm_to_vmem [thread:$0]  %s1326_s2, 4096, %s1254_s27, [#allocation6], %s1182_s7, %s1182_s7, %s1183_s8  }
  0x45   :  { %s1189_s23 = smov [#allocation10]   ;;  %s1129_s28 = scalar_lea.hbm %s1329_s5, 1024 }
  0x46   :  { %s68_s24 = sshll.u32 %s1189_s23, 4  ;;  %p1130_p4 = scmp.ne.s32.totalorder %s1329_s5, %s1129_s28  ;;  %s69_s24 = int_to_ptr.vmem [resolvable:$true] %s68_s24 }
  0x47   :  { %p1133_p5 = scmp.lt.u32.totalorder %s1129_s28, %s1329_s5 }
  0x49   :  { %p1135_p6 = pnand %p1133_p5, %p1130_p4 }
  0x4b   :  { %1138 = shalt.err (!%p1135_p6)
}
  0x4c   :  { %s1139_s11 = scalar_lea.vmem %s69_s24, 1024  ;;  %p1144_p8 = scmp.lt.s32.totalorder %s69_s24, %s69_s24 }
  0x4d   :  { %p1140_p7 = scmp.ne.s32.totalorder %s69_s24, %s1139_s11  ;;  %p1145_p9 = scmp.lt.s32.totalorder %s1139_s11, %s1139_s11 }
  0x4f   :  { %p1146_p10 = por %p1145_p9, %p1144_p8 }
  0x51   :  { %p1147_p11 = pnand %p1146_p10, %p1140_p7 }
  0x53   :  { %1150 = shalt.err (!%p1147_p11)
}
  0x54   :  { %74 = dma.hbm_to_vmem [thread:$0]  %s1329_s5, 1024, %s69_s24, [#allocation9], %s1182_s7, %s1182_s7, %s1183_s8  }
  0x55   :  { %1173 = dma.done.wait [#allocation3], 128  }
  0x56   :  { %1174 = vsyncadd [#allocation3], 4294967168 }
  0x57   :  { %1175 = dma.done.wait [#allocation6], 6144  }
  0x58   :  { %1176 = vsyncadd [#allocation6], 4294961152 }
  0x59   :  { %1177 = dma.done.wait [#allocation9], 3072  }
  0x5a   :  { %1178 = vsyncadd [#allocation9], 4294964224  ;;  %v1190_v0 = vmov 0   ;;  %v921_v1 = vld [vmem:[#allocation5 + $0x4] ss:$8 sps:$4 sm:$0xff]   ;;  %v94_v26 = vld [vmem:[#allocation2] sm:$0xff]  ;;  %v113_v63 = vlaneseq }
  0x5b   :  { %235 = vmatprep.mubr.bf16.mxu0 %v1190_v0  ;;  %v923_v2 = vld [vmem:[#allocation5] ss:$8 sps:$4 sm:$0xff]   ;;  %203 = vmatprep.subr.bf16.mxu0 %v921_v1  ;;  %v924_v3 = vld [vmem:[#allocation5 + $0x14] ss:$8 sps:$4 sm:$0xff]   ;;  %v926_v4 = vld [vmem:[#allocation5 + $0x10] ss:$8 sps:$4 sm:$0xff]   ;;  %v95_v31 = vpack.c.bf16 %v94_v26, %v94_v26 }
  0x5c   :  { %204 = vmatpush1.bf16.msra.mxu0 %v923_v2  ;;  %v927_v5 = vld [vmem:[#allocation5 + $0x24] ss:$8 sps:$4 sm:$0xff]   ;;  %v929_v6 = vld [vmem:[#allocation5 + $0x20] ss:$8 sps:$4 sm:$0xff]   ;;  %v930_v7 = vld [vmem:[#allocation5 + $0x34] ss:$8 sps:$4 sm:$0xff]  }
  0x5d   :  { %205 = vmatprep.subr.bf16.mxu0 %v924_v3  ;;  %v932_v8 = vld [vmem:[#allocation5 + $0x30] ss:$8 sps:$4 sm:$0xff]   ;;  %v933_v9 = vld [vmem:[#allocation5 + $0x44] ss:$8 sps:$4 sm:$0xff]   ;;  %v947_v11 = vld [vmem:[#allocation7] ss:$8 sps:$4 sm:$0xff]  }
  0x5e   :  { %v945_v10 = vld [vmem:[#allocation7 + $0x4] ss:$8 sps:$4 sm:$0xff]   ;;  %v948_v12 = vld [vmem:[#allocation7 + $0x14] ss:$8 sps:$4 sm:$0xff]   ;;  %v935_v13 = vld [vmem:[#allocation5 + $0x40] ss:$8 sps:$4 sm:$0xff]  }
  0x5f   :  { %451 = vmatprep.subr.bf16.mxu1 %v945_v10  ;;  %v950_v14 = vld [vmem:[#allocation7 + $0x10] ss:$8 sps:$4 sm:$0xff]   ;;  %v951_v15 = vld [vmem:[#allocation7 + $0x24] ss:$8 sps:$4 sm:$0xff]   ;;  %v936_v16 = vld [vmem:[#allocation5 + $0x54] ss:$8 sps:$4 sm:$0xff]  }
  0x60   :  { %206 = vmatpush1.bf16.msra.mxu0 %v926_v4  ;;  %452 = vmatpush1.bf16.msra.mxu1 %v947_v11  ;;  %v938_v17 = vld [vmem:[#allocation5 + $0x50] ss:$8 sps:$4 sm:$0xff]   ;;  %v953_v18 = vld [vmem:[#allocation7 + $0x20] ss:$8 sps:$4 sm:$0xff]   ;;  %v954_v19 = vld [vmem:[#allocation7 + $0x34] ss:$8 sps:$4 sm:$0xff]  }
  0x61   :  { %207 = vmatprep.subr.bf16.mxu0 %v927_v5  ;;  %453 = vmatprep.subr.bf16.mxu1 %v948_v12  ;;  %v939_v20 = vld [vmem:[#allocation5 + $0x64] ss:$8 sps:$4 sm:$0xff]   ;;  %v941_v21 = vld [vmem:[#allocation5 + $0x60] ss:$8 sps:$4 sm:$0xff]   ;;  %v956_v22 = vld [vmem:[#allocation7 + $0x30] ss:$8 sps:$4 sm:$0xff]  }
  0x62   :  { %v957_v23 = vld [vmem:[#allocation7 + $0x44] ss:$8 sps:$4 sm:$0xff]   ;;  %v942_v24 = vld [vmem:[#allocation5 + $0x74] ss:$8 sps:$4 sm:$0xff]   ;;  %v944_v25 = vld [vmem:[#allocation5 + $0x70] ss:$8 sps:$4 sm:$0xff]  }
  0x63   :  { %v959_v27 = vld [vmem:[#allocation7 + $0x40] ss:$8 sps:$4 sm:$0xff]   ;;  %v960_v28 = vld [vmem:[#allocation7 + $0x54] ss:$8 sps:$4 sm:$0xff]   ;;  %v962_v29 = vld [vmem:[#allocation7 + $0x50] ss:$8 sps:$4 sm:$0xff]  }
  0x64   :  { %208 = vmatpush1.bf16.msra.mxu0 %v929_v6  ;;  %454 = vmatpush1.bf16.msra.mxu1 %v950_v14  ;;  %v963_v30 = vld [vmem:[#allocation7 + $0x64] ss:$8 sps:$4 sm:$0xff]   ;;  %v965_v32 = vld [vmem:[#allocation7 + $0x60] ss:$8 sps:$4 sm:$0xff]   ;;  %v966_v33 = vld [vmem:[#allocation7 + $0x74] ss:$8 sps:$4 sm:$0xff]  }
  0x65   :  { %209 = vmatprep.subr.bf16.mxu0 %v930_v7  ;;  %455 = vmatprep.subr.bf16.mxu1 %v951_v15  ;;  %v968_v34 = vld [vmem:[#allocation7 + $0x70] ss:$8 sps:$4 sm:$0xff]   ;;  %v969_v35 = vld [vmem:[#allocation7 + $0x84] ss:$8 sps:$4 sm:$0xff]   ;;  %v971_v36 = vld [vmem:[#allocation7 + $0x80] ss:$8 sps:$4 sm:$0xff]  }
  0x66   :  { %v972_v37 = vld [vmem:[#allocation7 + $0x94] ss:$8 sps:$4 sm:$0xff]   ;;  %v974_v38 = vld [vmem:[#allocation7 + $0x90] ss:$8 sps:$4 sm:$0xff]   ;;  %v975_v39 = vld [vmem:[#allocation7 + $0xa4] ss:$8 sps:$4 sm:$0xff]  }
  0x67   :  { %v977_v40 = vld [vmem:[#allocation7 + $0xa0] ss:$8 sps:$4 sm:$0xff]   ;;  %v978_v41 = vld [vmem:[#allocation7 + $0xb4] ss:$8 sps:$4 sm:$0xff]   ;;  %v980_v42 = vld [vmem:[#allocation7 + $0xb0] ss:$8 sps:$4 sm:$0xff]  }
  0x68   :  { %210 = vmatpush1.bf16.msra.mxu0 %v932_v8  ;;  %456 = vmatpush1.bf16.msra.mxu1 %v953_v18  ;;  %v981_v43 = vld [vmem:[#allocation7 + $0xc4] ss:$8 sps:$4 sm:$0xff]   ;;  %v983_v44 = vld [vmem:[#allocation7 + $0xc0] ss:$8 sps:$4 sm:$0xff]   ;;  %v984_v45 = vld [vmem:[#allocation7 + $0xd4] ss:$8 sps:$4 sm:$0xff]  }
  0x69   :  { %211 = vmatprep.subr.bf16.mxu0 %v933_v9  ;;  %457 = vmatprep.subr.bf16.mxu1 %v954_v19  ;;  %v986_v46 = vld [vmem:[#allocation7 + $0xd0] ss:$8 sps:$4 sm:$0xff]   ;;  %v987_v47 = vld [vmem:[#allocation7 + $0xe4] ss:$8 sps:$4 sm:$0xff]   ;;  %v989_v48 = vld [vmem:[#allocation7 + $0xe0] ss:$8 sps:$4 sm:$0xff]  }
  0x6a   :  { %v990_v49 = vld [vmem:[#allocation7 + $0xf4] ss:$8 sps:$4 sm:$0xff]   ;;  %v992_v50 = vld [vmem:[#allocation7 + $0xf0] ss:$8 sps:$4 sm:$0xff]   ;;  %v993_v51 = vld [vmem:[#allocation8 + $0x40] sm:$0xff]   ;;  %v114_v0 = vshrl.u32 %v113_v63, 7 }
  0x6b   :  { %v994_v52 = vld [vmem:[#allocation8] sm:$0xff]   ;;  %v995_v53 = vld [vmem:[#allocation8 + $0x48] sm:$0xff]   ;;  %v997_v55 = vld [vmem:[#allocation8 + $0x50] sm:$0xff]  }
  0x6c   :  { %212 = vmatpush1.bf16.msra.mxu0 %v935_v13  ;;  %458 = vmatpush1.bf16.msra.mxu1 %v956_v22  ;;  %v996_v54 = vld [vmem:[#allocation8 + $0x8] sm:$0xff]   ;;  %v998_v56 = vld [vmem:[#allocation8 + $0x10] sm:$0xff]   ;;  %v999_v57 = vld [vmem:[#allocation8 + $0x58] sm:$0xff]   ;;  %v115_v1 = vsub.s32 0, %v114_v0  ;;  %v119_v3 = vsub.s32 1, %v114_v0 }
  0x6d   :  { %213 = vmatprep.subr.bf16.mxu0 %v936_v16  ;;  %459 = vmatprep.subr.bf16.mxu1 %v957_v23  ;;  %v1000_v58 = vld [vmem:[#allocation8 + $0x18] sm:$0xff]   ;;  %v1001_v59 = vld [vmem:[#allocation8 + $0x60] sm:$0xff]   ;;  %v1003_v61 = vld [vmem:[#allocation8 + $0x68] sm:$0xff]  }
  0x6e   :  { %v1002_v60 = vld [vmem:[#allocation8 + $0x20] sm:$0xff]   ;;  %v1004_v62 = vld [vmem:[#allocation8 + $0x28] sm:$0xff]   ;;  %v91_v2 = vld [vmem:[%s1328_s4] sm:$0x3] }
  0x6f   :  { %v116_v4 = vrot.slane %v91_v2, %v115_v1  ;;  %v120_v5 = vrot.slane %v91_v2, %v119_v3  ;;  %v1005_v16 = vld [vmem:[#allocation8 + $0x70] sm:$0xff]   ;;  %v1007_v18 = vld [vmem:[#allocation8 + $0x78] sm:$0xff]  }
  0x70   :  { %214 = vmatpush1.bf16.msra.mxu0 %v938_v17  ;;  %460 = vmatpush1.bf16.msra.mxu1 %v959_v27  ;;  %v1006_v17 = vld [vmem:[#allocation8 + $0x30] sm:$0xff]   ;;  %v1008_v19 = vld [vmem:[#allocation8 + $0x38] sm:$0xff]  }
  0x71   :  { %215 = vmatprep.subr.bf16.mxu0 %v939_v20  ;;  %461 = vmatprep.subr.bf16.mxu1 %v960_v28  ;;  %v92_v20 = vld [vmem:[%s1328_s4 + $0x2] sm:$0x3] }
  0x72   :  { %v288_v22 = vrot.slane %v92_v20, %v119_v3 }
  0x74   :  { %216 = vmatpush1.bf16.msra.mxu0 %v941_v21  ;;  %462 = vmatpush1.bf16.msra.mxu1 %v962_v29  ;;  %v284_v21 = vrot.slane %v92_v20, %v115_v1  ;;  %v704_v1 = vld [vmem:[#allocation10 + $0x10] sm:$0xff] }
  0x75   :  { %217 = vmatprep.subr.bf16.mxu0 %v942_v24  ;;  %463 = vmatprep.subr.bf16.mxu1 %v963_v30 }
  0x78   :  { %218 = vmatpush1.bf16.msra.mxu0 %v944_v25  ;;  %464 = vmatpush1.bf16.msra.mxu1 %v965_v32 }
  0x79   :  { %465 = vmatprep.subr.bf16.mxu1 %v966_v33  ;;  %888 = vmatprep.subr.bf16.mxu0 %v993_v51 }
  0x7b   :  { %236 = vmatmul.mubr.bf16.vlgmr.msra.gmra.mrb[0].mxu0 %v95_v31 }
  0x7c   :  { %466 = vmatpush1.bf16.msra.mxu1 %v968_v34  ;;  %889 = vmatpush3.bf16.msra.mxu0 %v994_v52  ;;  %v871_v34 = vld [vmem:[%s1328_s4 + $0x4] ss:$0 sm:$0xff]  ;;  %v687_v52 = vld [vmem:[#allocation10 + $0x8] sm:$0xff]  ;;  %s1191_s4 = smov [#allocation11]  }
  0x7d   :  { %467 = vmatprep.subr.bf16.mxu1 %v969_v35  ;;  %890 = vmatprep.subr.bf16.mxu0 %v995_v53  ;;  %s812_s14 = sshll.u32 %s1191_s4, 4  ;;  %s813_s14 = int_to_ptr.vmem [resolvable:$true] %s812_s14 }
  0x7e   :  { %s1151_s15 = scalar_lea.vmem %s813_s14, 128  ;;  %p1156_p13 = scmp.lt.s32.totalorder %s813_s14, %s813_s14 }
  0x7f   :  { %p1152_p12 = scmp.ne.s32.totalorder %s813_s14, %s1151_s15  ;;  %p1157_p0 = scmp.lt.s32.totalorder %s1151_s15, %s1151_s15 }
  0x80   :  { %468 = vmatpush1.bf16.msra.mxu1 %v971_v36  ;;  %891 = vmatpush3.bf16.msra.mxu0 %v996_v54 }
  0x81   :  { %469 = vmatprep.subr.bf16.mxu1 %v972_v37  ;;  %892 = vmatprep.subr.bf16.mxu0 %v997_v55  ;;  %p1158_p1 = por %p1157_p0, %p1156_p13 }
  0x83   :  { %p1159_p2 = pnand %p1158_p1, %p1152_p12 }
  0x84   :  { %470 = vmatpush1.bf16.msra.mxu1 %v974_v38  ;;  %893 = vmatpush3.bf16.msra.mxu0 %v998_v56 }
  0x85   :  { %471 = vmatprep.subr.bf16.mxu1 %v975_v39  ;;  %894 = vmatprep.subr.bf16.mxu0 %v999_v57  ;;  %v670_v39 = vld [vmem:[#allocation10] sm:$0xff] }
  0x88   :  { %472 = vmatpush1.bf16.msra.mxu1 %v977_v40  ;;  %895 = vmatpush3.bf16.msra.mxu0 %v1000_v58 }
  0x89   :  { %473 = vmatprep.subr.bf16.mxu1 %v978_v41  ;;  %896 = vmatprep.subr.bf16.mxu0 %v1001_v59 }
  0x8c   :  { %474 = vmatpush1.bf16.msra.mxu1 %v980_v42  ;;  %897 = vmatpush3.bf16.msra.mxu0 %v1002_v60 }
  0x8d   :  { %475 = vmatprep.subr.bf16.mxu1 %v981_v43  ;;  %898 = vmatprep.subr.bf16.mxu0 %v1003_v61 }
  0x90   :  { %476 = vmatpush1.bf16.msra.mxu1 %v983_v44  ;;  %899 = vmatpush3.bf16.msra.mxu0 %v1004_v62 }
  0x91   :  { %477 = vmatprep.subr.bf16.mxu1 %v984_v45  ;;  %900 = vmatprep.subr.bf16.mxu0 %v1005_v16  ;;  %v721_v16 = vld [vmem:[#allocation10 + $0x18] sm:$0xff] }
  0x94   :  { %478 = vmatpush1.bf16.msra.mxu1 %v986_v46  ;;  %901 = vmatpush3.bf16.msra.mxu0 %v1006_v17 }
  0x95   :  { %479 = vmatprep.subr.bf16.mxu1 %v987_v47  ;;  %902 = vmatprep.subr.bf16.mxu0 %v1007_v18 }
  0x98   :  { %480 = vmatpush1.bf16.msra.mxu1 %v989_v48  ;;  %903 = vmatpush3.bf16.msra.mxu0 %v1008_v19 }
  0x99   :  { %481 = vmatprep.subr.bf16.mxu1 %v990_v49 }
  0x9c   :  { %482 = vmatpush1.bf16.msra.mxu1 %v992_v50 }
 0x14e   :  { %v237_v6 = vpop.f32.mrb[0].mxu0 }
 0x14f   :  { %v238_v7 = vadd.f32 %v237_v6, %v116_v4  ;;  %v239_v8 = vpop.f32.mrb[1].mxu0 }
 0x150   :  { %v240_v9 = vadd.f32 %v239_v8, %v120_v5  ;;  %v241_v10 = vpop.f32.mrb[2].mxu0 }
 0x151   :  { %v244_v11 = vmax.f32 %v238_v7, 0.0  ;;  %v242_v12 = vpop.f32.mrb[3].mxu0 }
 0x152   :  { %v245_v13 = vmax.f32 %v240_v9, 0.0 }
 0x153   :  { %v246_v15 = vpack.c.bf16 %v244_v11, %v244_v11 }
 0x154   :  { %v247_v14 = vpack.c.bf16 %v245_v13, %v245_v13 }
 0x156   :  { %483 = vmatprep.mubr.bf16.mxu1 %v247_v14 }
 0x157   :  { %484 = vmatmul.mubr.bf16.vlgmr.msra.gmra.mrb[0].mxu1 %v246_v15 }
 0x22a   :  { %v485_v23 = vpop.f32.mrb[0].mxu1 }
 0x22b   :  { %v486_v24 = vadd.f32 %v485_v23, %v284_v21  ;;  %v487_v25 = vpop.f32.mrb[1].mxu1 }
 0x22c   :  { %v488_v26 = vadd.f32 %v487_v25, %v288_v22  ;;  %v489_v27 = vpop.f32.mrb[2].mxu1 }
 0x22d   :  { %v492_v28 = vmax.f32 %v486_v24, 0.0  ;;  %v490_v29 = vpop.f32.mrb[3].mxu1 }
 0x22e   :  { %v493_v30 = vmax.f32 %v488_v26, 0.0 }
 0x22f   :  { %v494_v32 = vpack.c.bf16 %v492_v28, %v492_v28 }
 0x230   :  { %v495_v31 = vpack.c.bf16 %v493_v30, %v493_v30  ;;  %v738_v30 = vld [vmem:[#allocation10 + $0x20] sm:$0xff] }
 0x232   :  { %662 = vmatprep.mubr.bf16.mxu0 %v495_v31 }
 0x233   :  { %663 = vmatmul.mubr.bf16.vlgmr.msra.gmra.mrb[4].mxu0 %v494_v32 }
 0x306   :  { %v904_v33 = vpop.f32.mrb[4].mxu0 }
 0x307   :  { %v905_v35 = vpop.f32.mrb[5].mxu0 }
 0x308   :  { %v906_v36 = vadd.f32 %v905_v35, %v904_v33  ;;  %v907_v37 = vpop.f32.mrb[6].mxu0 }
 0x309   :  { %v908_v38 = vpop.f32.mrb[7].mxu0 }
 0x30a   :  { %v665_v40 = vadd.f32 %v906_v36, %v871_v34 }
 0x30c   :  { %v671_v41 = vadd.f32 %v670_v39, %v665_v40 }
 0x30e   :  { %v672_v42 = vmul.f32 2.0, %v671_v41 }
 0x310   :  { %673 = vmax.xlane.f32.xlu0 %v672_v42 }
 0x39d   :  { %v674_v43 = vpop.xlane.xlu0 %673 }
 0x39e   :  { %v675_v44 = vsub.f32 %v672_v42, %v674_v43 }
 0x3a0   :  { %v676_v45 = vmul.f32 1.442695, %v675_v44  ;;  %v755_v44 = vld [vmem:[#allocation10 + $0x28] sm:$0xff] }
 0x3a2   :  { %1009 = vpow2.f32 %v676_v45 }
 0x3ac   :  { %v1010_v46 = vpop.eup %1009 }
 0x3ad   :  { %678 = vadd.xlane.f32.xlu0 %v1010_v46 }
 0x43a   :  { %v679_v47 = vpop.xlane.xlu0 %678 }
 0x43b   :  { %1011 = vrcp.f32 %v679_v47 }
 0x445   :  { %v1012_v48 = vpop.eup %1011 }
 0x446   :  { %v681_v49 = vmul.f32 %v1012_v48, %v679_v47 }
 0x448   :  { %v682_v50 = vsub.f32 2.0, %v681_v49 }
 0x44a   :  { %v683_v51 = vmul.f32 %v1012_v48, %v682_v50 }
 0x44c   :  { %v684_v53 = vmul.f32 %v1010_v46, %v683_v51 }
 0x44e   :  { %v688_v54 = vadd.f32 %v687_v52, %v684_v53  ;;  %v685_v2 = vmax.f32 %v684_v53, 0.0 }
 0x450   :  { %v689_v55 = vmul.f32 2.0, %v688_v54 }
 0x452   :  { %690 = vmax.xlane.f32.xlu1 %v689_v55 }
 0x4df   :  { %v691_v56 = vpop.xlane.xlu1 %690 }
 0x4e0   :  { %v692_v57 = vsub.f32 %v689_v55, %v691_v56 }
 0x4e2   :  { %v693_v58 = vmul.f32 1.442695, %v692_v57 }
 0x4e4   :  { %1013 = vpow2.f32 %v693_v58  ;;  %v772_v58 = vld [vmem:[#allocation10 + $0x30] sm:$0xff] }
 0x4ee   :  { %v1014_v59 = vpop.eup %1013 }
 0x4ef   :  { %695 = vadd.xlane.f32.xlu1 %v1014_v59 }
 0x57c   :  { %v696_v60 = vpop.xlane.xlu1 %695 }
 0x57d   :  { %1015 = vrcp.f32 %v696_v60 }
 0x587   :  { %v1016_v61 = vpop.eup %1015 }
 0x588   :  { %v698_v62 = vmul.f32 %v1016_v61, %v696_v60 }
 0x58a   :  { %v699_v63 = vsub.f32 2.0, %v698_v62 }
 0x58c   :  { %v700_v0 = vmul.f32 %v1016_v61, %v699_v63 }
 0x58e   :  { %v701_v3 = vmul.f32 %v1014_v59, %v700_v0 }
 0x590   :  { %v705_v4 = vadd.f32 %v704_v1, %v701_v3  ;;  %v702_v5 = vmax.f32 %v701_v3, %v685_v2 }
 0x592   :  { %v706_v6 = vmul.f32 2.0, %v705_v4 }
 0x594   :  { %707 = vmax.xlane.f32.xlu0 %v706_v6 }
 0x621   :  { %v708_v7 = vpop.xlane.xlu0 %707 }
 0x622   :  { %v709_v8 = vsub.f32 %v706_v6, %v708_v7 }
 0x624   :  { %v710_v9 = vmul.f32 1.442695, %v709_v8  ;;  %v789_v8 = vld [vmem:[#allocation10 + $0x38] sm:$0xff] }
 0x626   :  { %1017 = vpow2.f32 %v710_v9 }
 0x630   :  { %v1018_v10 = vpop.eup %1017 }
 0x631   :  { %712 = vadd.xlane.f32.xlu1 %v1018_v10 }
 0x6be   :  { %v713_v11 = vpop.xlane.xlu1 %712 }
 0x6bf   :  { %1019 = vrcp.f32 %v713_v11 }
 0x6c9   :  { %v1020_v12 = vpop.eup %1019 }
 0x6ca   :  { %v715_v13 = vmul.f32 %v1020_v12, %v713_v11 }
 0x6cc   :  { %v716_v14 = vsub.f32 2.0, %v715_v13 }
 0x6ce   :  { %v717_v15 = vmul.f32 %v1020_v12, %v716_v14 }
 0x6d0   :  { %v718_v17 = vmul.f32 %v1018_v10, %v717_v15 }
 0x6d2   :  { %v722_v18 = vadd.f32 %v721_v16, %v718_v17  ;;  %v719_v19 = vmax.f32 %v718_v17, %v702_v5 }
 0x6d4   :  { %v723_v20 = vmul.f32 2.0, %v722_v18 }
 0x6d6   :  { %724 = vmax.xlane.f32.xlu0 %v723_v20 }
 0x763   :  { %v725_v21 = vpop.xlane.xlu0 %724 }
 0x764   :  { %v726_v22 = vsub.f32 %v723_v20, %v725_v21 }
 0x766   :  { %v727_v23 = vmul.f32 1.442695, %v726_v22 }
 0x768   :  { %1021 = vpow2.f32 %v727_v23 }
 0x772   :  { %v1022_v24 = vpop.eup %1021 }
 0x773   :  { %729 = vadd.xlane.f32.xlu1 %v1022_v24 }
 0x800   :  { %v730_v25 = vpop.xlane.xlu1 %729 }
 0x801   :  { %1023 = vrcp.f32 %v730_v25 }
 0x80b   :  { %v1024_v26 = vpop.eup %1023 }
 0x80c   :  { %v732_v27 = vmul.f32 %v1024_v26, %v730_v25 }
 0x80e   :  { %v733_v28 = vsub.f32 2.0, %v732_v27 }
 0x810   :  { %v734_v29 = vmul.f32 %v1024_v26, %v733_v28 }
 0x812   :  { %v735_v31 = vmul.f32 %v1022_v24, %v734_v29 }
 0x814   :  { %v739_v32 = vadd.f32 %v738_v30, %v735_v31  ;;  %v736_v33 = vmax.f32 %v735_v31, %v719_v19 }
 0x816   :  { %v740_v34 = vmul.f32 2.0, %v739_v32 }
 0x818   :  { %741 = vmax.xlane.f32.xlu0 %v740_v34 }
 0x8a5   :  { %v742_v35 = vpop.xlane.xlu0 %741 }
 0x8a6   :  { %v743_v36 = vsub.f32 %v740_v34, %v742_v35 }
 0x8a8   :  { %v744_v37 = vmul.f32 1.442695, %v743_v36 }
 0x8aa   :  { %1025 = vpow2.f32 %v744_v37 }
 0x8b4   :  { %v1026_v38 = vpop.eup %1025 }
 0x8b5   :  { %746 = vadd.xlane.f32.xlu1 %v1026_v38 }
 0x942   :  { %v747_v39 = vpop.xlane.xlu1 %746 }
 0x943   :  { %1027 = vrcp.f32 %v747_v39 }
 0x94d   :  { %v1028_v40 = vpop.eup %1027 }
 0x94e   :  { %v749_v41 = vmul.f32 %v1028_v40, %v747_v39 }
 0x950   :  { %v750_v42 = vsub.f32 2.0, %v749_v41 }
 0x952   :  { %v751_v43 = vmul.f32 %v1028_v40, %v750_v42 }
 0x954   :  { %v752_v45 = vmul.f32 %v1026_v38, %v751_v43 }
 0x956   :  { %v756_v46 = vadd.f32 %v755_v44, %v752_v45  ;;  %v753_v47 = vmax.f32 %v752_v45, %v736_v33 }
 0x958   :  { %v757_v48 = vmul.f32 2.0, %v756_v46 }
 0x95a   :  { %758 = vmax.xlane.f32.xlu0 %v757_v48 }
 0x9e7   :  { %v759_v49 = vpop.xlane.xlu0 %758 }
 0x9e8   :  { %v760_v50 = vsub.f32 %v757_v48, %v759_v49 }
 0x9ea   :  { %v761_v51 = vmul.f32 1.442695, %v760_v50 }
 0x9ec   :  { %1029 = vpow2.f32 %v761_v51 }
 0x9f6   :  { %v1030_v52 = vpop.eup %1029 }
 0x9f7   :  { %763 = vadd.xlane.f32.xlu1 %v1030_v52 }
 0xa84   :  { %v764_v53 = vpop.xlane.xlu1 %763 }
 0xa85   :  { %1031 = vrcp.f32 %v764_v53 }
 0xa8f   :  { %v1032_v54 = vpop.eup %1031 }
 0xa90   :  { %v766_v55 = vmul.f32 %v1032_v54, %v764_v53 }
 0xa92   :  { %v767_v56 = vsub.f32 2.0, %v766_v55 }
 0xa94   :  { %v768_v57 = vmul.f32 %v1032_v54, %v767_v56 }
 0xa96   :  { %v769_v59 = vmul.f32 %v1030_v52, %v768_v57 }
 0xa98   :  { %v773_v60 = vadd.f32 %v772_v58, %v769_v59  ;;  %v770_v61 = vmax.f32 %v769_v59, %v753_v47 }
 0xa9a   :  { %v774_v62 = vmul.f32 2.0, %v773_v60 }
 0xa9c   :  { %775 = vmax.xlane.f32.xlu0 %v774_v62 }
 0xb29   :  { %v776_v63 = vpop.xlane.xlu0 %775 }
 0xb2a   :  { %v777_v0 = vsub.f32 %v774_v62, %v776_v63 }
 0xb2c   :  { %v778_v1 = vmul.f32 1.442695, %v777_v0 }
 0xb2e   :  { %1033 = vpow2.f32 %v778_v1 }
 0xb38   :  { %v1034_v2 = vpop.eup %1033 }
 0xb39   :  { %780 = vadd.xlane.f32.xlu1 %v1034_v2 }
 0xbc6   :  { %v781_v3 = vpop.xlane.xlu1 %780 }
 0xbc7   :  { %1035 = vrcp.f32 %v781_v3 }
 0xbd1   :  { %v1036_v4 = vpop.eup %1035 }
 0xbd2   :  { %v783_v5 = vmul.f32 %v1036_v4, %v781_v3 }
 0xbd4   :  { %v784_v6 = vsub.f32 2.0, %v783_v5 }
 0xbd6   :  { %v785_v7 = vmul.f32 %v1036_v4, %v784_v6 }
 0xbd8   :  { %v786_v9 = vmul.f32 %v1034_v2, %v785_v7 }
 0xbda   :  { %v790_v10 = vadd.f32 %v789_v8, %v786_v9  ;;  %v787_v11 = vmax.f32 %v786_v9, %v770_v61 }
 0xbdc   :  { %v791_v12 = vmul.f32 2.0, %v790_v10 }
 0xbde   :  { %792 = vmax.xlane.f32.xlu0 %v791_v12 }
 0xc6b   :  { %v793_v13 = vpop.xlane.xlu0 %792 }
 0xc6c   :  { %v794_v14 = vsub.f32 %v791_v12, %v793_v13 }
 0xc6e   :  { %v795_v15 = vmul.f32 1.442695, %v794_v14 }
 0xc70   :  { %1037 = vpow2.f32 %v795_v15 }
 0xc7a   :  { %v1038_v16 = vpop.eup %1037 }
 0xc7b   :  { %797 = vadd.xlane.f32.xlu1 %v1038_v16 }
 0xd08   :  { %v798_v17 = vpop.xlane.xlu1 %797 }
 0xd09   :  { %1039 = vrcp.f32 %v798_v17 }
 0xd13   :  { %v1040_v18 = vpop.eup %1039 }
 0xd14   :  { %v800_v19 = vmul.f32 %v1040_v18, %v798_v17 }
 0xd16   :  { %v801_v20 = vsub.f32 2.0, %v800_v19 }
 0xd18   :  { %v802_v21 = vmul.f32 %v1040_v18, %v801_v20 }
 0xd1a   :  { %v803_v22 = vmul.f32 %v1038_v16, %v802_v21 }
 0xd1c   :  { %v804_v23 = vmax.f32 %v803_v22, %v787_v11 }
 0xd1e   :  { %805 = vst [vmem:[#allocation11] sm:$0xff] %v804_v23 }
 0xd1f   :  { %1162 = shalt.err (!%p1159_p2)
}
 0xd20   :  { %s1163_s18 = scalar_lea.hbm %s1330_s6, 128 }
 0xd21   :  { %p1164_p3 = scmp.ne.s32.totalorder %s1330_s6, %s1163_s18  ;;  %p1167_p4 = scmp.lt.u32.totalorder %s1163_s18, %s1330_s6 }
 0xd23   :  { %p1169_p5 = pnand %p1167_p4, %p1164_p3 }
 0xd25   :  { %1172 = shalt.err (!%p1169_p5)
}
 0xd26   :  { %815 = dma.vmem_to_hbm [thread:$0]  %s813_s14, 128, %s1330_s6, [#allocation4]  }
 0xd27   :  { %1179 = dma.done.wait [#allocation4], 128  }
 0xd28   :  { %1180 = vsyncadd [#allocation4], 4294967168 }
 0xd29   :  { %819 = vsyncpa [#allocation3], 1 }
 0xd2a   :  { %820 = vsyncpa [#allocation6], 1 }
 0xd2b   :  { %821 = vsyncpa [#allocation9], 1 }
 0xd2c   :  { %822 = vsyncpa [#allocation4], 1 }

</bundles_post_ra>
